<compile_context>
chip_gen: v7x
topology: tpu7x:2x2x1
jax: 0.10.0
libtpu: 0.0.40
codegen_flags: <defaults>
</compile_context>

<pallas_src>
import math
from functools import partial

import numpy as np
import jax
import jax.numpy as jnp
from jax.experimental import pallas as pl
from jax.experimental.pallas import tpu as pltpu


# --------------------------- host-side helpers (numpy) ---------------------------

def _resize_matrix(out_size, in_size):
    """Row-interpolation matrix matching torch bilinear, align_corners=False."""
    i = np.arange(out_size)
    src = (i + 0.5) * in_size / out_size - 0.5
    src = np.clip(src, 0.0, in_size - 1)
    i0 = np.floor(src).astype(np.int64)
    i1 = np.minimum(i0 + 1, in_size - 1)
    w1 = (src - i0).astype(np.float32)
    w0 = 1.0 - w1
    R = np.zeros((out_size, in_size), dtype=np.float32)
    R[np.arange(out_size), i0] += w0
    R[np.arange(out_size), i1] += w1
    return R


def _const2d_spec(a):
    """Whole-array 2-D block, same block at every grid step (DMA'd once)."""
    return pl.BlockSpec(a.shape, lambda i: (0, 0))


# ----------------------- kernel 1: fused resize + patch embed -----------------------

def _embed_kernel(x_ref, w_ref, b_ref, cam_ref, reg_ref, o_ref, *, n_patch, dim, t_pad):
    # x_ref: (1, 1, C*H*W) raw pixels for one frame; w_ref folds
    # bilinear-resize * 0.5 + 0.5 + patchify conv; b_ref folds conv bias + pos-embed.
    x = x_ref[0].astype(jnp.bfloat16)                                    # [1, K]
    y = jnp.dot(x, w_ref[...], preferred_element_type=jnp.float32)       # [1, n_patch*dim]
    y = y + b_ref[...]

    n_reg = reg_ref.shape[0]
    ps = 1 + n_reg                                                       # patch-start index
    o_ref[0] = jnp.zeros((t_pad, dim), jnp.float32)                      # zero incl. pad rows
    o_ref[0, 0:1, :] = cam_ref[...]                                      # camera token
    o_ref[0, 1:1 + n_reg, :] = reg_ref[...]                              # register tokens
    for pi in range(n_patch):                                            # lane-aligned 128-wide slices
        o_ref[0, ps + pi:ps + pi + 1, :] = y[:, pi * dim:(pi + 1) * dim]


def embed_tokens(x_flat, w_pe, b_pe, cam, reg, *, n_patch, dim, t_pad):
    """x_flat: [S, C*H*W] -> padded tokens [S, t_pad, dim] (cam | reg | patches | zero-pad)."""
    S, K = x_flat.shape
    x3 = x_flat.reshape(S, 1, K)
    return pl.pallas_call(
        partial(_embed_kernel, n_patch=n_patch, dim=dim, t_pad=t_pad),
        grid=(S,),
        in_specs=[pl.BlockSpec((1, 1, K), lambda i: (i, 0, 0)),
                  _const2d_spec(w_pe), _const2d_spec(b_pe),
                  _const2d_spec(cam), _const2d_spec(reg)],
        out_specs=pl.BlockSpec((1, t_pad, dim), lambda i: (i, 0, 0)),
        out_shape=jax.ShapeDtypeStruct((S, t_pad, dim), jnp.float32),
        compiler_params=pltpu.CompilerParams(dimension_semantics=("parallel",)),
    )(x3, w_pe, b_pe, cam, reg)


# ----------------------- kernel 2: fused pre-LN transformer block -----------------------

def _block_kernel(x_ref, ln1g_ref, ln1b_ref, wqkv_ref, bqkv_ref, wo_ref, bo_ref,
                  ln2g_ref, ln2b_ref, wfc1_ref, bfc1_ref, wfc2_ref, bfc2_ref,
                  o_ref, *, num_heads, t_pad, t_valid, eps):
    Tseq = x_ref.shape[1]
    D = x_ref.shape[2]
    dh = D // num_heads
    scale = 1.0 / math.sqrt(dh)

    def ln(z, g_ref, b_ref):
        mu = jnp.mean(z, axis=-1, keepdims=True)
        zc = z - mu
        var = jnp.mean(zc * zc, axis=-1, keepdims=True)
        return zc * jax.lax.rsqrt(var + eps) * g_ref[...] + b_ref[...]

    x = x_ref[0]                                                         # [Tseq, D] f32

    # ---- attention (bf16 MXU for the big projections, f32 softmax) ----
    h = ln(x, ln1g_ref, ln1b_ref)
    qkv = jnp.dot(h.astype(jnp.bfloat16), wqkv_ref[...],
                  preferred_element_type=jnp.float32) + bqkv_ref[...]    # [Tseq, 3D]
    q = qkv[:, 0 * D:1 * D]
    k = qkv[:, 1 * D:2 * D]
    v = qkv[:, 2 * D:3 * D]

    # mask padded token positions (position idx % t_pad >= t_valid) as keys
    pos = jax.lax.broadcasted_iota(jnp.int32, (1, Tseq), 1)
    key_bias = jnp.where((pos % t_pad) < t_valid, 0.0, -1e30).astype(jnp.float32)

    head_outs = []
    for hi in range(num_heads):                                          # static unroll, data in VMEM
        qh = q[:, hi * dh:(hi + 1) * dh]
        kh = k[:, hi * dh:(hi + 1) * dh]
        vh = v[:, hi * dh:(hi + 1) * dh]
        s = jnp.dot(qh, kh.T, preferred_element_type=jnp.float32) * scale + key_bias
        s = s - jnp.max(s, axis=-1, keepdims=True)
        p = jnp.exp(s)
        p = p * pl.reciprocal(jnp.sum(p, axis=-1, keepdims=True), approx=True)
        head_outs.append(jnp.dot(p, vh, preferred_element_type=jnp.float32))
    attn = jnp.concatenate(head_outs, axis=-1)                           # [Tseq, D]

    x = x + jnp.dot(attn.astype(jnp.bfloat16), wo_ref[...],
                    preferred_element_type=jnp.float32) + bo_ref[...]    # residual in-kernel

    # ---- MLP ----
    h2 = ln(x, ln2g_ref, ln2b_ref)
    m = jnp.dot(h2.astype(jnp.bfloat16), wfc1_ref[...],
                preferred_element_type=jnp.float32) + bfc1_ref[...]
    # TODO(synk): real VGGT/DINOv2 uses exact (erf) GELU; tanh approximation used here.
    m = jax.nn.gelu(m, approximate=True)
    x = x + jnp.dot(m.astype(jnp.bfloat16), wfc2_ref[...],
                    preferred_element_type=jnp.float32) + bfc2_ref[...]  # residual in-kernel

    o_ref[0] = x.astype(o_ref.dtype)


def fused_block(x, p, *, num_heads, t_pad, t_valid, eps=1e-6):
    """One full pre-LN transformer block.  x: [B, Tseq, D] (Tseq multiple of 8, D=128)."""
    B, Tseq, D = x.shape
    weights = [p["ln1_g"], p["ln1_b"], p["w_qkv"], p["b_qkv"], p["w_o"], p["b_o"],
               p["ln2_g"], p["ln2_b"], p["w_fc1"], p["b_fc1"], p["w_fc2"], p["b_fc2"]]
    return pl.pallas_call(
        partial(_block_kernel, num_heads=num_heads, t_pad=t_pad, t_valid=t_valid, eps=eps),
        grid=(B,),
        in_specs=[pl.BlockSpec((1, Tseq, D), lambda i: (i, 0, 0))]
                 + [_const2d_spec(w) for w in weights],
        out_specs=pl.BlockSpec((1, Tseq, D), lambda i: (i, 0, 0)),
        out_shape=jax.ShapeDtypeStruct((B, Tseq, D), jnp.float32),
        compiler_params=pltpu.CompilerParams(dimension_semantics=("parallel",)),
    )(x, *weights)


# --------------------------------- parameters ---------------------------------

def _init_block_params(key, D, mlp_ratio=4):
    keys = jax.random.split(key, 4)
    s = 0.02
    Hm = mlp_ratio * D
    f32, bf16 = jnp.float32, jnp.bfloat16
    return {
        "ln1_g": jnp.ones((1, D), f32), "ln1_b": jnp.zeros((1, D), f32),
        "w_qkv": (s * jax.random.normal(keys[0], (D, 3 * D), f32)).astype(bf16),
        "b_qkv": jnp.zeros((1, 3 * D), f32),
        "w_o": (s * jax.random.normal(keys[1], (D, D), f32)).astype(bf16),
        "b_o": jnp.zeros((1, D), f32),
        "ln2_g": jnp.ones((1, D), f32), "ln2_b": jnp.zeros((1, D), f32),
        "w_fc1": (s * jax.random.normal(keys[2], (D, Hm), f32)).astype(bf16),
        "b_fc1": jnp.zeros((1, Hm), f32),
        "w_fc2": (s * jax.random.normal(keys[3], (Hm, D), f32)).astype(bf16),
        "b_fc2": jnp.zeros((1, D), f32),
    }


# --------------------------------- VGGT encoder ---------------------------------

class VGGTEncoderPallas:
    def __init__(self, key, *, embed_dim=128, num_heads=4, patch=8, img_size=16,
                 num_register=4, depth=2, in_chans=3):
        self.D = embed_dim
        self.num_heads = num_heads
        self.patch = patch
        self.img_size = img_size
        self.num_register = num_register
        self.ps_idx = 1 + num_register              # camera token + register tokens
        self.depth = depth
        self.in_chans = in_chans

        nh = img_size // patch
        self.num_patches = nh * nh
        self.t_valid = 1 + num_register + self.num_patches   # 9
        self.t_pad = ((self.t_valid + 7) // 8) * 8            # 16 -> (8,128)-aligned blocks

        keys = jax.random.split(key, 4 + 2 * depth)
        s = 0.02
        # patch-embed weights kept on host (numpy) so the resize composition is host-side.
        self.patch_w = np.asarray(
            s * jax.random.normal(keys[0], (in_chans * patch * patch, embed_dim), jnp.float32))
        self.patch_b = np.zeros((embed_dim,), np.float32)
        self.pos_embed = np.asarray(
            s * jax.random.normal(keys[1], (self.num_patches, embed_dim), jnp.float32))
        self.camera_token = s * jax.random.normal(keys[2], (1, embed_dim), jnp.float32)
        self.register_tokens = s * jax.random.normal(keys[3], (num_register, embed_dim), jnp.float32)
        self.frame_blocks = [_init_block_params(keys[4 + 2 * i], embed_dim) for i in range(depth)]
        self.global_blocks = [_init_block_params(keys[5 + 2 * i], embed_dim) for i in range(depth)]
        self._pe_cache = {}

    def _patch_embed_weights(self, H, W):
        """Pre-compose bilinear resize (*0.5+0.5) + patchify conv + pos-embed into one matmul."""
        if (H, W) in self._pe_cache:
            return self._pe_cache[(H, W)]
        p, D, C = self.patch, self.D, self.in_chans
        nh = nw = self.img_size // p
        RH = _resize_matrix(self.img_size, H).reshape(nh, p, H)           # [nh, p, H]
        RW = _resize_matrix(self.img_size, W).reshape(nw, p, W)           # [nw, p, W]
        pw = self.patch_w.reshape(C, p, p, D)                             # (c, dy, dx, d)
        W_pe = 0.5 * np.einsum("ayu,bxv,cyxd->cuvabd", RH, RW, pw)        # [C,H,W,nh,nw,D]
        W_pe = W_pe.reshape(C * H * W, nh * nw * D).astype(np.float32)
        b_d = 0.5 * pw.sum(axis=(0, 1, 2)) + self.patch_b                 # '+0.5' affine folded
        b_pe = (b_d[None, :] + self.pos_embed).reshape(1, nh * nw * D)    # pos-embed folded
        out = (jnp.asarray(W_pe, jnp.bfloat16), jnp.asarray(b_pe, jnp.float32))
        self._pe_cache[(H, W)] = out
        return out

    def __call__(self, pixel_values):
        S, C, H, W = pixel_values.shape             # NCHW, S == number of frames
        D = self.D

        # --- prepare_input + patch embedding + token assembly (one fused kernel) ---
        w_pe, b_pe = self._patch_embed_weights(H, W)
        x_flat = pixel_values.reshape(S, C * H * W).astype(jnp.float32)
        tokens = embed_tokens(x_flat, w_pe, b_pe, self.camera_token, self.register_tokens,
                              n_patch=self.num_patches, dim=D, t_pad=self.t_pad)
        # tokens: [S, t_pad, D]; rows >= t_valid are zero pad, masked in attention.

        # --- alternating frame / global attention; collect aggregated tokens ---
        aggregated = []
        for fp, gp in zip(self.frame_blocks, self.global_blocks):
            frame_out = fused_block(tokens, fp, num_heads=self.num_heads,
                                    t_pad=self.t_pad, t_valid=self.t_valid)       # per-frame attn
            glob_out = fused_block(frame_out.reshape(1, S * self.t_pad, D), gp,
                                   num_heads=self.num_heads,
                                   t_pad=self.t_pad, t_valid=self.t_valid
                                   ).reshape(S, self.t_pad, D)                     # cross-frame attn
            tokens = glob_out
            aggregated.append(jnp.concatenate(
                [frame_out[:, :self.t_valid], glob_out[:, :self.t_valid]], axis=-1)[None])

        # --- VGGT_Encoder.forward tail ---
        spatial_feat = aggregated[-1].astype(pixel_values.dtype)    # to(pixel_values.dtype)
        spatial_feat = spatial_feat[0]                              # squeeze(0) -> [S, T, 2D]
        camera_token = spatial_feat[:, 0:1, :]
        patch_tokens = spatial_feat[:, self.ps_idx:, :]
        return camera_token, patch_tokens


# ------------------------------------- main -------------------------------------

if __name__ == "__main__":
    key = jax.random.PRNGKey(0)
    pkey, wkey = jax.random.split(key)

    # Small, module-consistent shapes: 2 frames, RGB, 8x8 spatial (NCHW).
    pixel_values = jax.random.normal(pkey, (2, 3, 8, 8), dtype=jnp.float32)

    enc = VGGTEncoderPallas(wkey)
    camera_token, patch_tokens = enc(pixel_values)
    jax.block_until_ready((camera_token, patch_tokens))

    assert camera_token.shape == (2, 1, 2 * enc.D)
    assert patch_tokens.shape == (2, (enc.img_size // enc.patch) ** 2, 2 * enc.D)
    assert camera_token.dtype == pixel_values.dtype
    print("KERNEL_OK")
</pallas_src>

<mosaic_0001>
module attributes {stable_mosaic.version = 11 : i64} {
  func.func @_embed_kernel(%arg0: i32, %arg1: memref<1x1x192xf32, #tpu.memory_space<vmem>>, %arg2: memref<192x512xbf16, #tpu.memory_space<vmem>>, %arg3: memref<1x512xf32, #tpu.memory_space<vmem>>, %arg4: memref<1x128xf32, #tpu.memory_space<vmem>>, %arg5: memref<4x128xf32, #tpu.memory_space<vmem>>, %arg6: memref<1x16x128xf32, #tpu.memory_space<vmem>>) attributes {dimension_semantics = [#tpu.dimension_semantics<parallel>], iteration_bounds = array<i64: 2>, scalar_prefetch = 0 : i64, scratch_operands = 0 : i64, tpu.core_type = #tpu.core_type<tc>, window_params = [{transform_indices = @transform_0, window_bounds = array<i64: 1, 1, 192>}, {pipeline_mode = #tpu.pipeline_mode<synchronous>, transform_indices = @transform_1, window_bounds = array<i64: 192, 512>}, {pipeline_mode = #tpu.pipeline_mode<synchronous>, transform_indices = @transform_2, window_bounds = array<i64: 1, 512>}, {pipeline_mode = #tpu.pipeline_mode<synchronous>, transform_indices = @transform_3, window_bounds = array<i64: 1, 128>}, {pipeline_mode = #tpu.pipeline_mode<synchronous>, transform_indices = @transform_4, window_bounds = array<i64: 4, 128>}, {transform_indices = @transform_5, window_bounds = array<i64: 1, 16, 128>}]} {
    %c0 = arith.constant 0 : index
    %c0_0 = arith.constant 0 : index
    %c0_1 = arith.constant 0 : index
    %0 = vector.load %arg1[%c0, %c0_0, %c0_1] : memref<1x1x192xf32, #tpu.memory_space<vmem>>, vector<1x1x192xf32>
    %1 = vector.shape_cast %0 : vector<1x1x192xf32> to vector<1x192xf32>
    %2 = arith.truncf %1 : vector<1x192xf32> to vector<1x192xbf16>
    %c0_2 = arith.constant 0 : index
    %c0_3 = arith.constant 0 : index
    %3 = vector.load %arg2[%c0_2, %c0_3] : memref<192x512xbf16, #tpu.memory_space<vmem>>, vector<192x512xbf16>
    %cst = arith.constant dense<0.000000e+00> : vector<1x512xf32>
    %4 = tpu.matmul %2, %3, %cst {dimension_numbers = #tpu.dot_dimension_numbers<[1], [0], [0], [1], [0, 0, 1, 1], [], []>} : vector<1x192xbf16>, vector<192x512xbf16>, vector<1x512xf32> -> vector<1x512xf32>
    %c0_4 = arith.constant 0 : index
    %c0_5 = arith.constant 0 : index
    %5 = vector.load %arg3[%c0_4, %c0_5] : memref<1x512xf32, #tpu.memory_space<vmem>>, vector<1x512xf32>
    %6 = arith.addf %4, %5 : vector<1x512xf32>
    %cst_6 = arith.constant 0.000000e+00 : f32
    %7 = vector.broadcast %cst_6 : f32 to vector<16x128xf32>
    %c0_7 = arith.constant 0 : index
    %c0_8 = arith.constant 0 : index
    %c0_9 = arith.constant 0 : index
    %8 = vector.load %arg6[%c0_7, %c0_8, %c0_9] : memref<1x16x128xf32, #tpu.memory_space<vmem>>, vector<1x16x128xf32>
    %9 = vector.shape_cast %8 : vector<1x16x128xf32> to vector<16x128xf32>
    %10 = vector.shape_cast %7 : vector<16x128xf32> to vector<1x16x128xf32>
    tpu.vector_store %arg6[%c0_7, %c0_8, %c0_9], %10 {strides = array<i32>} : memref<1x16x128xf32, #tpu.memory_space<vmem>>, vector<1x16x128xf32>,
    %c0_10 = arith.constant 0 : index
    %c0_11 = arith.constant 0 : index
    %11 = vector.load %arg4[%c0_10, %c0_11] : memref<1x128xf32, #tpu.memory_space<vmem>>, vector<1x128xf32>
    %c0_12 = arith.constant 0 : index
    %c0_13 = arith.constant 0 : index
    %c0_14 = arith.constant 0 : index
    %12 = vector.load %arg6[%c0_12, %c0_13, %c0_14] : memref<1x16x128xf32, #tpu.memory_space<vmem>>, vector<1x1x128xf32>
    %13 = vector.shape_cast %12 : vector<1x1x128xf32> to vector<1x128xf32>
    %14 = vector.shape_cast %11 : vector<1x128xf32> to vector<1x1x128xf32>
    tpu.vector_store %arg6[%c0_12, %c0_13, %c0_14], %14 {strides = array<i32>} : memref<1x16x128xf32, #tpu.memory_space<vmem>>, vector<1x1x128xf32>,
    %c0_15 = arith.constant 0 : index
    %c0_16 = arith.constant 0 : index
    %15 = vector.load %arg5[%c0_15, %c0_16] : memref<4x128xf32, #tpu.memory_space<vmem>>, vector<4x128xf32>
    %c0_17 = arith.constant 0 : index
    %c1 = arith.constant 1 : index
    %c0_18 = arith.constant 0 : index
    %16 = vector.load %arg6[%c0_17, %c1, %c0_18] : memref<1x16x128xf32, #tpu.memory_space<vmem>>, vector<1x4x128xf32>
    %17 = vector.shape_cast %16 : vector<1x4x128xf32> to vector<4x128xf32>
    %18 = vector.shape_cast %15 : vector<4x128xf32> to vector<1x4x128xf32>
    tpu.vector_store %arg6[%c0_17, %c1, %c0_18], %18 {strides = array<i32>} : memref<1x16x128xf32, #tpu.memory_space<vmem>>, vector<1x4x128xf32>,
    %19 = vector.extract_strided_slice %6 {offsets = [0, 0], sizes = [1, 128], strides = [1, 1]} : vector<1x512xf32> to vector<1x128xf32>
    %c0_19 = arith.constant 0 : index
    %c5 = arith.constant 5 : index
    %c0_20 = arith.constant 0 : index
    %20 = vector.load %arg6[%c0_19, %c5, %c0_20] : memref<1x16x128xf32, #tpu.memory_space<vmem>>, vector<1x1x128xf32>
    %21 = vector.shape_cast %20 : vector<1x1x128xf32> to vector<1x128xf32>
    %22 = vector.shape_cast %19 : vector<1x128xf32> to vector<1x1x128xf32>
    tpu.vector_store %arg6[%c0_19, %c5, %c0_20], %22 {strides = array<i32>} : memref<1x16x128xf32, #tpu.memory_space<vmem>>, vector<1x1x128xf32>,
    %23 = vector.extract_strided_slice %6 {offsets = [0, 128], sizes = [1, 128], strides = [1, 1]} : vector<1x512xf32> to vector<1x128xf32>
    %c0_21 = arith.constant 0 : index
    %c6 = arith.constant 6 : index
    %c0_22 = arith.constant 0 : index
    %24 = vector.load %arg6[%c0_21, %c6, %c0_22] : memref<1x16x128xf32, #tpu.memory_space<vmem>>, vector<1x1x128xf32>
    %25 = vector.shape_cast %24 : vector<1x1x128xf32> to vector<1x128xf32>
    %26 = vector.shape_cast %23 : vector<1x128xf32> to vector<1x1x128xf32>
    tpu.vector_store %arg6[%c0_21, %c6, %c0_22], %26 {strides = array<i32>} : memref<1x16x128xf32, #tpu.memory_space<vmem>>, vector<1x1x128xf32>,
    %27 = vector.extract_strided_slice %6 {offsets = [0, 256], sizes = [1, 128], strides = [1, 1]} : vector<1x512xf32> to vector<1x128xf32>
    %c0_23 = arith.constant 0 : index
    %c7 = arith.constant 7 : index
    %c0_24 = arith.constant 0 : index
    %28 = vector.load %arg6[%c0_23, %c7, %c0_24] : memref<1x16x128xf32, #tpu.memory_space<vmem>>, vector<1x1x128xf32>
    %29 = vector.shape_cast %28 : vector<1x1x128xf32> to vector<1x128xf32>
    %30 = vector.shape_cast %27 : vector<1x128xf32> to vector<1x1x128xf32>
    tpu.vector_store %arg6[%c0_23, %c7, %c0_24], %30 {strides = array<i32>} : memref<1x16x128xf32, #tpu.memory_space<vmem>>, vector<1x1x128xf32>,
    %31 = vector.extract_strided_slice %6 {offsets = [0, 384], sizes = [1, 128], strides = [1, 1]} : vector<1x512xf32> to vector<1x128xf32>
    %c0_25 = arith.constant 0 : index
    %c8 = arith.constant 8 : index
    %c0_26 = arith.constant 0 : index
    %32 = vector.load %arg6[%c0_25, %c8, %c0_26] : memref<1x16x128xf32, #tpu.memory_space<vmem>>, vector<1x1x128xf32>
    %33 = vector.shape_cast %32 : vector<1x1x128xf32> to vector<1x128xf32>
    %34 = vector.shape_cast %31 : vector<1x128xf32> to vector<1x1x128xf32>
    tpu.vector_store %arg6[%c0_25, %c8, %c0_26], %34 {strides = array<i32>} : memref<1x16x128xf32, #tpu.memory_space<vmem>>, vector<1x1x128xf32>,
    return
  }
  func.func @transform_0(%arg0: i32) -> (i32, i32, i32) {
    %c0_i32 = arith.constant 0 : i32
    %c0_i32_0 = arith.constant 0 : i32
    %c0_i32_1 = arith.constant 0 : i32
    return %arg0, %c0_i32, %c0_i32_0 : i32, i32, i32
  }
  func.func @transform_1(%arg0: i32) -> (i32, i32) {
    %c0_i32 = arith.constant 0 : i32
    %c0_i32_0 = arith.constant 0 : i32
    %c0_i32_1 = arith.constant 0 : i32
    return %c0_i32, %c0_i32_0 : i32, i32
  }
  func.func @transform_2(%arg0: i32) -> (i32, i32) {
    %c0_i32 = arith.constant 0 : i32
    %c0_i32_0 = arith.constant 0 : i32
    %c0_i32_1 = arith.constant 0 : i32
    return %c0_i32, %c0_i32_0 : i32, i32
  }
  func.func @transform_3(%arg0: i32) -> (i32, i32) {
    %c0_i32 = arith.constant 0 : i32
    %c0_i32_0 = arith.constant 0 : i32
    %c0_i32_1 = arith.constant 0 : i32
    return %c0_i32, %c0_i32_0 : i32, i32
  }
  func.func @transform_4(%arg0: i32) -> (i32, i32) {
    %c0_i32 = arith.constant 0 : i32
    %c0_i32_0 = arith.constant 0 : i32
    %c0_i32_1 = arith.constant 0 : i32
    return %c0_i32, %c0_i32_0 : i32, i32
  }
  func.func @transform_5(%arg0: i32) -> (i32, i32, i32) {
    %c0_i32 = arith.constant 0 : i32
    %c0_i32_0 = arith.constant 0 : i32
    %c0_i32_1 = arith.constant 0 : i32
    return %arg0, %c0_i32, %c0_i32_0 : i32, i32, i32
  }
}

</mosaic_0001>

<bundles_post_ra>
// kernel: tpu_custom_call.1
= control target key start
LH: loop header
LB: loop body
LE: loop exit
PB: predicated region body
PF: predicated region fallthrough
CT: control target
= control target key end

     0   :  { %10 = vsyncpa [#allocation3], 0  ;;  %s1372_s0 = inlined_call_operand.hbm [shape: f32[2,1,192], index: 0, kind: input, shape index: {}]   ;;  %s1373_s1 = inlined_call_operand.hbm [shape: bf16[192,512], index: 1, kind: input, shape index: {}]   ;;  %s1374_s2 = inlined_call_operand.vmem [shape: f32[1,512], index: 2, kind: input, shape index: {}]   ;;  %s1375_s3 = inlined_call_operand.vmem [shape: f32[1,128], index: 3, kind: input, shape index: {}]   ;;  %s1376_s4 = inlined_call_operand.vmem [shape: f32[4,128], index: 4, kind: input, shape index: {}]   ;;  %s1377_s5 = inlined_call_operand.hbm [shape: f32[2,16,128], index: 5, kind: output, shape index: {}]  }
   0x1   :  { %12 = vsyncpa [#allocation3 + $0x1], 0 }
   0x2   :  { %13 = vsyncpa [#allocation6], 0 }
   0x3   :  { %14 = vsyncpa [#allocation4], 0 }
   0x4   :  { %16 = vsyncpa [#allocation4 + $0x1], 0  ;;  %s1144_s18 = smov 0   ;;  %s1146_s19 = smov 0  }
   0x5   :  { %s1148_s20 = smov 0   ;;  %s1150_s21 = smov 0  }
   0x6 LB: > { %s1165_s22 = sadd.s32 4294967295, %s1104_s21   ;;  %s774_s23 = sadd.s32 4294967294, %s1104_s21   ;;  %s1104_s21 = sphi %s1150_s21, %s1397_s21   ;;  %s1100_s20 = sphi %s1148_s20, %s1396_s20   ;;  %s1096_s19 = sphi %s1146_s19, %s1395_s19   ;;  %s1092_s18 = sphi %s1144_s18, %s1394_s18  }
   0x7   : > { %p42_p0 = scmp.ne.s32.totalorder %s1096_s19, %s1092_s18  ;;  %p1378_p1 = scmp.eq.s32.totalorder %s1165_s22, 0 }
   0x8   : > { %p156_p3 = scmp.eq.s32.totalorder %s774_s23, 1  ;;  %p775_p5 = scmp.ge.s32.totalorder %s1104_s21, 1 }
   0x9   : > { %p1174_p4 = por %p1378_p1, %p42_p0  ;;  %p163_p7 = scmp.lt.s32.totalorder %s1104_s21, 3 }
   0xa   : > { %p1179_p6 = por %p156_p3, %p42_p0  ;;  %s1106_s27 = smov [#allocation5]  }
   0xb   : > { %s1381_s24 = scalar_select %p1174_p4, 1, 0 }
   0xc   : > { %s1382_s25 = scalar_select %p1179_p6, 1, 0 }
   0xd   : > { %p1184_p8 = pnand %p775_p5, %p163_p7  ;;  %s175_s28 = sshll.u32 %s1106_s27, 4  ;;  %s1188_s28 = int_to_ptr.vmem [resolvable:$true] %s175_s28 }
   0xe   : > { %s1200_s30 = sadd.s32 1, %s1104_s21   ;;  %s29_s6 = sadd.s32 1, %s1100_s20 }
   0xf   : > { %s1383_s26 = scalar_select %p1184_p8, 1, 0 }
  0x10   : > { %p850_p9 = pneg %p1184_p8  ;;  %s26_s7 = ssub.s32 %s1104_s21, %s1200_s30 }
  0x11   : > { %s976_s10 = scalar_lea.hbm %s1373_s1, 6144 }
  0x12   : > { %p1195_p11 = pnand %p850_p9, %p1378_p1  ;;  %p977_p12 = scmp.ne.s32.totalorder %s1373_s1, %s976_s10 }
  0x13   : > { %p983_p5 = scmp.lt.u32.totalorder %s976_s10, %s1373_s1 }
  0x14   : > { %p978_p13 = pneg %p1195_p11 }
  0x16   : > { %p979_p0 = pnand %p978_p13, %p977_p12 }
  0x18   : > { %p980_p3 = pneg %p979_p0 }
  0x1a   : > { %p985_p7 = pnand %p983_p5, %p980_p3 }
  0x1c   : > { %988 = shalt.err (!%p985_p7)
}
  0x1d   : > { %s989_s15 = scalar_lea.vmem %s1188_s28, 6144  ;;  %p997_p2 = scmp.lt.s32.totalorder %s1188_s28, %s1188_s28 }
  0x1e   : > { %p990_p9 = scmp.ne.s32.totalorder %s1188_s28, %s989_s15  ;;  %p998_p6 = scmp.lt.s32.totalorder %s989_s15, %s989_s15 }
  0x20   : > { %p992_p10 = pnand %p990_p9, %p978_p13  ;;  %p999_p4 = por %p998_p6, %p997_p2 }
  0x22   : > { %p993_p1 = pneg %p992_p10 }
  0x24   : > { %p1000_p8 = pnand %p999_p4, %p993_p1 }
  0x26   : > { %1003 = shalt.err (!%p1000_p8)
}
  0x27   : > { %s1107_s16 = smov 256   ;;  %s1108_s17 = smov 16  }
  0x28   : > { %853 = dma.hbm_to_vmem [thread:$0]  (!%p1195_p11), %s1373_s1, 6144, %s1188_s28, [#allocation6], %s1107_s16, %s1107_s16, %s1108_s17  }
  0x29   : > { %p27_p2 = scmp.eq.s32.totalorder %s26_s7, 0  ;;  %p36_p1 = scmp.ne.s32.totalorder %s1100_s20, %s1096_s19 }
  0x2a   : > { %p37_p4 = scmp.eq.s32.totalorder %s1104_s21, 0  ;;  %p863_p6 = scmp.lt.s32.totalorder %s1104_s21, 2 }
  0x2b   : > { %s1231_s8 = scalar_select %p27_p2, %s1100_s20, %s29_s6  }
  0x2c   : > { %p38_p8 = por %p37_p4, %p36_p1  ;;  %p1385_p10 = scmp.eq.s32.totalorder %s1165_s22, 1 }
  0x2d   : > { %s198_s10 = sand.u32 1, %s1100_s20   ;;  %s840_s11 = sshll.u32 %s1104_s21, 5 }
  0x2e   : > { %p1235_p12 = por %p1385_p10, %p36_p1  ;;  %s778_s12 = sshll.u32 %s198_s10, 1 }
  0x2f   : > { %s1244_s14 = scalar_lea.hbm %s1372_s0, %s840_s11  ;;  %s202_s28 = scalar_lea.vmem [#allocation2], %s778_s12 }
  0x30   : > { %s210_s6 = sshll.u32 %s202_s28, 4  ;;  %p1246_p11 = pnand %p863_p6, %p38_p8  ;;  %s1250_s6 = int_to_ptr.vmem [resolvable:$true] %s210_s6 }
  0x31   : > { %s199_s15 = scalar_lea.sflag [#allocation3], %s198_s10  ;;  %s1004_s16 = scalar_lea.hbm %s1244_s14, 32 }
  0x32   : > { %p1005_p13 = scmp.ne.s32.totalorder %s1244_s14, %s1004_s16  ;;  %p1006_p0 = pneg %p1246_p11 }
  0x33   : > { %s1009_s27 = scalar_lea.hbm %s1372_s0, 64  ;;  %p1010_p7 = scmp.lt.u32.totalorder %s1244_s14, %s1372_s0 }
  0x34   : > { %p1007_p3 = pnand %p1006_p0, %p1005_p13  ;;  %p1011_p9 = scmp.lt.u32.totalorder %s1009_s27, %s1004_s16 }
  0x35   : > { %p1013_p1 = scmp.lt.u32.totalorder %s1004_s16, %s1244_s14 }
  0x36   : > { %p1008_p5 = pneg %p1007_p3  ;;  %p1012_p2 = por %p1011_p9, %p1010_p7 }
  0x38   : > { %p1014_p4 = por %p1013_p1, %p1012_p2 }
  0x3a   : > { %p1015_p6 = pnand %p1014_p4, %p1008_p5 }
  0x3c   : > { %1018 = shalt.err (!%p1015_p6)
}
  0x3d   : > { %s1019_s10 = scalar_lea.vmem %s1250_s6, 32  ;;  %s1109_s29 = smov [#allocation2]  }
  0x3e   : > { %p1020_p8 = scmp.ne.s32.totalorder %s1250_s6, %s1019_s10  ;;  %s1024_s13 = sshll.u32 %s1109_s29, 4  ;;  %s1025_s13 = int_to_ptr.vmem [resolvable:$false] %s1024_s13 }
  0x3f   : > { %s1026_s28 = scalar_lea.vmem %s1025_s13, 64  ;;  %p1027_p3 = scmp.lt.s32.totalorder %s1250_s6, %s1025_s13 }
  0x40   : > { %p1022_p10 = pnand %p1020_p8, %p1006_p0  ;;  %p1028_p7 = scmp.lt.s32.totalorder %s1026_s28, %s1019_s10 }
  0x42   : > { %p1023_p13 = pneg %p1022_p10  ;;  %p1029_p9 = por %p1028_p7, %p1027_p3 }
  0x44   : > { %p1030_p2 = pnand %p1029_p9, %p1023_p13 }
  0x46   : > { %1033 = shalt.err (!%p1030_p2)
}
  0x47   : > { %857 = dma.hbm_to_vmem [thread:$0]  (!%p1246_p11), %s1244_s14, 32, %s1250_s6, %s199_s15  }
  0x48   : > { %p1388_p5 = scmp.ne.s32.totalorder %s1383_s26, 0 }
  0x49   : > { %s1280_s16 = sand.u32 (!%p1388_p5), 1, %s1096_s19   ;;  %p1389_p0 = scmp.ne.s32.totalorder (!%p1388_p5), %s1381_s24, 0 }
  0x4a   : > { %219 = sbr.rel (%p1388_p5) target bundleno = 364 (0x16c), region = 40  ;;  %s782_s17 = sshll.u32 (!%p1388_p5), %s1280_s16, 1 }
  0x4b   : > { %s222_s23 = scalar_lea.sflag (!%p1388_p5), [#allocation3], %s1280_s16  ;;  %s1284_s27 = scalar_lea.vmem (!%p1388_p5), [#allocation2], %s782_s17 }
  0x51   : > { %1079 = dma.done.wait (%p1389_p0), %s222_s23, 32  }
  0x52   : > { %1081 = vsyncadd (%p1389_p0), %s222_s23, 4294967264  ;;  %p1390_p11 = scmp.eq.s32.totalorder %s1165_s22, 0 }
  0x54   : > { %1083 = dma.done.wait (%p1390_p11), [#allocation6], 6144   ;;  %p1391_p1 = pmov %p1390_p11 }
  0x55   : > { %v904_v0 = vld [vmem:[#allocation5 + $0x4] ss:$16 sps:$4 sm:$0xff]   ;;  %v906_v1 = vld [vmem:[#allocation5 + $0xc] ss:$16 sps:$4 sm:$0xff]   ;;  %v908_v2 = vld [vmem:[#allocation5] ss:$16 sps:$4 sm:$0xff]   ;;  %v259_v26 = vlaneseq }
  0x56   : > { %1085 = vsyncadd (%p1391_p1), [#allocation6], 4294961152  ;;  %585 = vmatprep.subr.bf16.mxu0 %v904_v0  ;;  %v909_v3 = vld [vmem:[#allocation5 + $0x8] ss:$16 sps:$4 sm:$0xff]   ;;  %626 = vmatprep.subr.bf16.mxu1 %v906_v1  ;;  %v910_v4 = vld [vmem:[#allocation5 + $0x24] ss:$16 sps:$4 sm:$0xff]  }
  0x57   : > { %586 = vmatpush1.bf16.msra.mxu0 %v908_v2  ;;  %627 = vmatpush1.bf16.msra.mxu1 %v909_v3  ;;  %v912_v5 = vld [vmem:[#allocation5 + $0x2c] ss:$16 sps:$4 sm:$0xff]   ;;  %v914_v6 = vld [vmem:[#allocation5 + $0x20] ss:$16 sps:$4 sm:$0xff]   ;;  %v915_v7 = vld [vmem:[#allocation5 + $0x28] ss:$16 sps:$4 sm:$0xff]  }
  0x58   : > { %587 = vmatprep.subr.bf16.mxu0 %v910_v4  ;;  %628 = vmatprep.subr.bf16.mxu1 %v912_v5  ;;  %v916_v8 = vld [vmem:[#allocation5 + $0x44] ss:$16 sps:$4 sm:$0xff]   ;;  %v918_v9 = vld [vmem:[#allocation5 + $0x4c] ss:$16 sps:$4 sm:$0xff]   ;;  %v920_v10 = vld [vmem:[#allocation5 + $0x40] ss:$16 sps:$4 sm:$0xff]  }
  0x59   : > { %v921_v11 = vld [vmem:[#allocation5 + $0x48] ss:$16 sps:$4 sm:$0xff]   ;;  %v922_v12 = vld [vmem:[#allocation5 + $0x64] ss:$16 sps:$4 sm:$0xff]   ;;  %v924_v13 = vld [vmem:[#allocation5 + $0x6c] ss:$16 sps:$4 sm:$0xff]  }
  0x5a   : > { %v926_v14 = vld [vmem:[#allocation5 + $0x60] ss:$16 sps:$4 sm:$0xff]   ;;  %v927_v15 = vld [vmem:[#allocation5 + $0x68] ss:$16 sps:$4 sm:$0xff]   ;;  %v928_v16 = vld [vmem:[#allocation5 + $0x84] ss:$16 sps:$4 sm:$0xff]  }
  0x5b   : > { %588 = vmatpush1.bf16.msra.mxu0 %v914_v6  ;;  %629 = vmatpush1.bf16.msra.mxu1 %v915_v7  ;;  %v930_v17 = vld [vmem:[#allocation5 + $0x8c] ss:$16 sps:$4 sm:$0xff]   ;;  %v932_v18 = vld [vmem:[#allocation5 + $0x80] ss:$16 sps:$4 sm:$0xff]   ;;  %v933_v19 = vld [vmem:[#allocation5 + $0x88] ss:$16 sps:$4 sm:$0xff]  }
  0x5c   : > { %589 = vmatprep.subr.bf16.mxu0 %v916_v8  ;;  %630 = vmatprep.subr.bf16.mxu1 %v918_v9  ;;  %v934_v20 = vld [vmem:[#allocation5 + $0xa4] ss:$16 sps:$4 sm:$0xff]   ;;  %v936_v21 = vld [vmem:[#allocation5 + $0xac] ss:$16 sps:$4 sm:$0xff]   ;;  %v938_v22 = vld [vmem:[#allocation5 + $0xa0] ss:$16 sps:$4 sm:$0xff]  }
  0x5d   : > { %v939_v23 = vld [vmem:[#allocation5 + $0xa8] ss:$16 sps:$4 sm:$0xff]   ;;  %v940_v24 = vld [vmem:[#allocation5 + $0xc4] ss:$16 sps:$4 sm:$0xff]   ;;  %v942_v25 = vld [vmem:[#allocation5 + $0xcc] ss:$16 sps:$4 sm:$0xff]  }
  0x5e   : > { %v944_v27 = vld [vmem:[#allocation5 + $0xc0] ss:$16 sps:$4 sm:$0xff]   ;;  %v945_v28 = vld [vmem:[#allocation5 + $0xc8] ss:$16 sps:$4 sm:$0xff]   ;;  %v946_v29 = vld [vmem:[#allocation5 + $0xe4] ss:$16 sps:$4 sm:$0xff]  }
  0x5f   : > { %590 = vmatpush1.bf16.msra.mxu0 %v920_v10  ;;  %631 = vmatpush1.bf16.msra.mxu1 %v921_v11  ;;  %v948_v30 = vld [vmem:[#allocation5 + $0xec] ss:$16 sps:$4 sm:$0xff]   ;;  %v1294_v31 = vshrl.u32 %v259_v26, 7  ;;  %v950_v32 = vld [vmem:[#allocation5 + $0xe0] ss:$16 sps:$4 sm:$0xff]   ;;  %vm581_vm0 = vcmask 523264  }
  0x60   : > { %591 = vmatprep.subr.bf16.mxu0 %v922_v12  ;;  %632 = vmatprep.subr.bf16.mxu1 %v924_v13  ;;  %v951_v33 = vld [vmem:[#allocation5 + $0xe8] ss:$16 sps:$4 sm:$0xff]   ;;  %v952_v34 = vld [vmem:[#allocation5 + $0x104] ss:$16 sps:$4 sm:$0xff]   ;;  %v954_v35 = vld [vmem:[#allocation5 + $0x10c] ss:$16 sps:$4 sm:$0xff]  }
  0x61   : > { %v265_v36 = vsub.s32 1, %v1294_v31  ;;  %v956_v37 = vld [vmem:[#allocation5 + $0x100] ss:$16 sps:$4 sm:$0xff]   ;;  %v957_v38 = vld [vmem:[#allocation5 + $0x108] ss:$16 sps:$4 sm:$0xff]   ;;  %v261_v48 = vsub.s32 0, %v1294_v31 }
  0x62   : > { %v257_v39 = vld [vmem:[%s1284_s27] sm:$0x3]  ;;  %v958_v40 = vld [vmem:[#allocation5 + $0x124] ss:$16 sps:$4 sm:$0xff]   ;;  %v962_v44 = vld [vmem:[#allocation5 + $0x120] ss:$16 sps:$4 sm:$0xff]  }
  0x63   : > { %592 = vmatpush1.bf16.msra.mxu0 %v926_v14  ;;  %633 = vmatpush1.bf16.msra.mxu1 %v927_v15  ;;  %v960_v41 = vld [vmem:[#allocation5 + $0x12c] ss:$16 sps:$4 sm:$0xff]   ;;  %v266_v42 = vrot.slane %v257_v39, %v265_v36  ;;  %v963_v45 = vld [vmem:[#allocation5 + $0x128] ss:$16 sps:$4 sm:$0xff]   ;;  %v964_v46 = vld [vmem:[#allocation5 + $0x144] ss:$16 sps:$4 sm:$0xff]   ;;  %v262_v53 = vrot.slane %v257_v39, %v261_v48 }
  0x64   : > { %593 = vmatprep.subr.bf16.mxu0 %v928_v16  ;;  %634 = vmatprep.subr.bf16.mxu1 %v930_v17  ;;  %v966_v47 = vld [vmem:[#allocation5 + $0x14c] ss:$16 sps:$4 sm:$0xff]   ;;  %v968_v49 = vld [vmem:[#allocation5 + $0x140] ss:$16 sps:$4 sm:$0xff]   ;;  %v969_v50 = vld [vmem:[#allocation5 + $0x148] ss:$16 sps:$4 sm:$0xff]  }
  0x65   : > { %v270_v43 = vpack.c.bf16 %v266_v42, %v266_v42  ;;  %v970_v51 = vld [vmem:[#allocation5 + $0x164] ss:$16 sps:$4 sm:$0xff]   ;;  %v972_v52 = vld [vmem:[#allocation5 + $0x16c] ss:$16 sps:$4 sm:$0xff]   ;;  %v974_v54 = vld [vmem:[#allocation5 + $0x160] ss:$16 sps:$4 sm:$0xff]   ;;  %v269_v56 = vpack.c.bf16 %v262_v53, %v262_v53 }
  0x66   : > { %v975_v55 = vld [vmem:[#allocation5 + $0x168] ss:$16 sps:$4 sm:$0xff]   ;;  %s784_s24 = sshll.u32 %s1280_s16, 4  ;;  %v669_v57 = vld [vmem:[%s1375_s3] sm:$0x1]  ;;  %v1110_v59 = vmov 0.0  }
  0x67   : > { %594 = vmatpush1.bf16.msra.mxu0 %v932_v18  ;;  %635 = vmatpush1.bf16.msra.mxu1 %v933_v19  ;;  %v671_v58 = vld [vmem:[%s1376_s4] sm:$0xf]  ;;  %s1306_s15 = scalar_lea.vmem [#allocation7], %s784_s24  ;;  %v571_v60 = vsub.s32 2, %v1294_v31  ;;  %v575_v62 = vsub.s32 3, %v1294_v31  ;;  %s841_s10 = sshll.u32 %s1165_s22, 8 }
  0x68   : > { %595 = vmatprep.subr.bf16.mxu0 %v934_v20  ;;  %636 = vmatprep.subr.bf16.mxu1 %v936_v21  ;;  %667 = vst [vmem:[%s1306_s15] sm:$0xff] %v1110_v59  ;;  %668 = vst [vmem:[%s1306_s15 + $0x8] sm:$0xff] %v1110_v59  ;;  %v319_v61 = vld [vmem:[%s1374_s2] sm:$0xf]  ;;  %s691_s29 = sshll.u32 %s1306_s15, 4  ;;  %s1322_s17 = scalar_lea.hbm %s1377_s5, %s841_s10  ;;  %s1324_s29 = int_to_ptr.vmem [resolvable:$true] %s691_s29 }
  0x69   : > { %833 = vmatprep.mubr.msk.bf16.mxu0 %vm581_vm0, %v270_v43  ;;  %834 = vmatprep.mubr.msk.bf16.mxu1 %vm581_vm0, %v270_v43  ;;  %670 = vst [vmem:[%s1306_s15] sm:$0x1] %v669_v57  ;;  %672 = vst [vmem:[%s1306_s15 + $0x1] sm:$0xf] %v671_v58  ;;  %v564_v63 = vrot.slane %v319_v61, %v261_v48  ;;  %v572_v0 = vrot.slane %v319_v61, %v571_v60  ;;  %s678_s22 = scalar_lea.sflag [#allocation4], %s1280_s16  ;;  %s1034_s23 = scalar_lea.vmem %s1324_s29, 256 }
  0x6a   : > { %v568_v1 = vrot.slane %v319_v61, %v265_v36  ;;  %v576_v2 = vrot.slane %v319_v61, %v575_v62  ;;  %p1035_p4 = scmp.ne.s32.totalorder %s1324_s29, %s1034_s23  ;;  %s1111_s27 = smov [#allocation7]  }
  0x6b   : > { %596 = vmatpush1.bf16.msra.mxu0 %v938_v22  ;;  %637 = vmatpush1.bf16.msra.mxu1 %v939_v23  ;;  %s1038_s24 = sshll.u32 %s1111_s27, 4  ;;  %s1039_s24 = int_to_ptr.vmem [resolvable:$false] %s1038_s24 }
  0x6c   : > { %597 = vmatprep.subr.bf16.mxu0 %v940_v24  ;;  %638 = vmatprep.subr.bf16.mxu1 %v942_v25  ;;  %p1036_p6 = pnand %p1035_p4, %p1235_p12  ;;  %s1040_s26 = scalar_lea.vmem %s1039_s24, 512 }
  0x6d   : > { %p1041_p10 = scmp.lt.s32.totalorder %s1324_s29, %s1039_s24  ;;  %p1042_p13 = scmp.lt.s32.totalorder %s1040_s26, %s1034_s23 }
  0x6e   : > { %p1037_p8 = pneg %p1036_p6 }
  0x6f   : > { %598 = vmatpush1.bf16.msra.mxu0 %v944_v27  ;;  %639 = vmatpush1.bf16.msra.mxu1 %v945_v28  ;;  %p1043_p3 = por %p1042_p13, %p1041_p10 }
  0x70   : > { %599 = vmatprep.subr.bf16.mxu0 %v946_v29  ;;  %640 = vmatprep.subr.bf16.mxu1 %v948_v30 }
  0x71   : > { %p1044_p7 = pnand %p1043_p3, %p1037_p8 }
  0x73   : > { %600 = vmatpush1.bf16.msra.mxu0 %v950_v32  ;;  %641 = vmatpush1.bf16.msra.mxu1 %v951_v33 }
  0x74   : > { %601 = vmatprep.subr.bf16.mxu0 %v952_v34  ;;  %642 = vmatprep.subr.bf16.mxu1 %v954_v35 }
  0x77   : > { %602 = vmatpush1.bf16.msra.mxu0 %v956_v37  ;;  %643 = vmatpush1.bf16.msra.mxu1 %v957_v38 }
  0x78   : > { %603 = vmatprep.subr.bf16.mxu0 %v958_v40  ;;  %644 = vmatprep.subr.bf16.mxu1 %v960_v41 }
  0x7b   : > { %604 = vmatpush1.bf16.msra.mxu0 %v962_v44  ;;  %645 = vmatpush1.bf16.msra.mxu1 %v963_v45 }
  0x7c   : > { %605 = vmatprep.subr.bf16.mxu0 %v964_v46  ;;  %646 = vmatprep.subr.bf16.mxu1 %v966_v47 }
  0x7f   : > { %606 = vmatpush1.bf16.msra.mxu0 %v968_v49  ;;  %647 = vmatpush1.bf16.msra.mxu1 %v969_v50 }
  0x80   : > { %607 = vmatprep.subr.bf16.mxu0 %v970_v51  ;;  %648 = vmatprep.subr.bf16.mxu1 %v972_v52 }
  0x83   : > { %608 = vmatpush1.bf16.msra.mxu0 %v974_v54  ;;  %649 = vmatpush1.bf16.msra.mxu1 %v975_v55 }
  0x86   : > { %618 = vmatmul.mubr.bf16.vlgmr.msra.gmra.mrb[0].mxu0 %v269_v56  ;;  %659 = vmatmul.mubr.bf16.vlgmr.msra.gmra.mrb[0].mxu1 %v269_v56 }
 0x159   : > { %v619_v3 = vpop.f32.mrb[0].mxu0  ;;  %v660_v4 = vpop.f32.mrb[0].mxu1 }
 0x15a   : > { %v620_v5 = vadd.f32 %v619_v3, %v564_v63  ;;  %v661_v6 = vadd.f32 %v660_v4, %v572_v0  ;;  %v621_v7 = vpop.f32.mrb[1].mxu0  ;;  %v662_v8 = vpop.f32.mrb[1].mxu1 }
 0x15b   : > { %v622_v9 = vadd.f32 %v621_v7, %v568_v1  ;;  %v663_v10 = vadd.f32 %v662_v8, %v576_v2  ;;  %v623_v11 = vpop.f32.mrb[2].mxu0  ;;  %v664_v12 = vpop.f32.mrb[2].mxu1 }
 0x15c   : > { %673 = vst [vmem:[%s1306_s15 + $0x5] sm:$0x1] %v620_v5  ;;  %675 = vst [vmem:[%s1306_s15 + $0x7] sm:$0x1] %v661_v6  ;;  %v624_v13 = vpop.f32.mrb[3].mxu0  ;;  %v665_v14 = vpop.f32.mrb[3].mxu1 }
 0x15d   : > { %674 = vst [vmem:[%s1306_s15 + $0x6] sm:$0x1] %v622_v9  ;;  %676 = vst [vmem:[%s1306_s15 + $0x8] sm:$0x1] %v663_v10 }
 0x15e   : > { %1047 = shalt.err (!%p1044_p7)
}
 0x15f   : > { %s1048_s14 = scalar_lea.hbm %s1322_s17, 256  ;;  %s1052_s15 = scalar_lea.hbm %s1377_s5, 512 }
 0x160   : > { %p1049_p9 = scmp.ne.s32.totalorder %s1322_s17, %s1048_s14  ;;  %p1053_p0 = scmp.lt.u32.totalorder %s1322_s17, %s1377_s5 }
 0x161   : > { %p1054_p11 = scmp.lt.u32.totalorder %s1052_s15, %s1048_s14  ;;  %p1056_p4 = scmp.lt.u32.totalorder %s1048_s14, %s1322_s17 }
 0x162   : > { %p1050_p2 = pnand %p1049_p9, %p1235_p12 }
 0x163   : > { %p1055_p1 = por %p1054_p11, %p1053_p0 }
 0x164   : > { %p1051_p5 = pneg %p1050_p2 }
 0x165   : > { %p1057_p6 = por %p1056_p4, %p1055_p1 }
 0x167   : > { %p1058_p8 = pnand %p1057_p6, %p1051_p5 }
 0x169   : > { %1061 = shalt.err (!%p1058_p8)
}
 0x16a   : > { %s1112_s10 = smov 128   ;;  %s1113_s13 = smov 8  }
 0x16b   : > { %848 = dma.vmem_to_hbm [thread:$0]  (%p1235_p12), %s1324_s29, 256, %s1322_s17, %s678_s22, %s1112_s10, %s1112_s10, %s1113_s13  }
 0x16c PF: > { %s706_s28 = sand.u32 1, %s1092_s18   ;;  %p1392_p10 = scmp.ne.s32.totalorder %s1382_s25, 0 }
 0x16d   : > { %p1393_p13 = scmp.ge.s32.totalorder %s1104_s21, 2  ;;  %s707_s23 = scalar_lea.sflag [#allocation4], %s706_s28 }
 0x16f   : > { %p859_p3 = pnand %p1393_p13, %p1392_p10 }
 0x171   : > { %1087 = dma.done.wait (!%p859_p3), %s707_s23, 256  }
 0x172   : > { %1089 = vsyncadd (!%p859_p3), %s707_s23, 4294967040  ;;  %p19_p7 = scmp.ge.s32.totalorder %s1200_s30, 4   ;;  %s1394_s18 = smov %s1096_s19 }
 0x173   : > { %s1395_s19 = smov %s1100_s20  ;;  %s1396_s20 = smov %s1231_s8 }
 0x174   : > { %s1397_s21 = smov %s1200_s30  ;;  %21 = sbr.rel (!%p19_p7) target bundleno = 6 (0x6), region = 89 }
 0x17b   :  { %712 = vsyncpa [#allocation3], 1 }
 0x17c   :  { %714 = vsyncpa [#allocation3 + $0x1], 1 }
 0x17d   :  { %715 = vsyncpa [#allocation6], 1 }
 0x17e   :  { %716 = vsyncpa [#allocation4], 1 }
 0x17f   :  { %718 = vsyncpa [#allocation4 + $0x1], 1 }

</bundles_post_ra>
